<compile_context>
chip_gen: v6e
topology: v6e:2x2x1
jax: 0.10.0
libtpu: 0.0.40
codegen_flags: <defaults>
</compile_context>

<pallas_src>
import functools

import jax
import jax.numpy as jnp
from jax import lax
from jax.experimental import pallas as pl
from jax.experimental.pallas import tpu as pltpu


def _round_up(n, m):
    return ((n + m - 1) // m) * m


def _softplus(x):
    # Numerically stable softplus: log(1 + exp(x)).
    return jnp.maximum(x, 0.0) + jnp.log1p(jnp.exp(-jnp.abs(x)))


def actor_kernel(x_ref, w1_ref, b1_ref, w2_ref, b2_ref, wh_ref, bh_ref, out_ref,
                 *, action_bound):
    # ---- trunk: two MXU matmuls (bf16 in, f32 accumulate), bias/ReLU in f32 ----
    x = x_ref[...].astype(jnp.bfloat16)                                # [TB, n_states]
    h1 = jnp.dot(x, w1_ref[...], preferred_element_type=jnp.float32) + b1_ref[...]
    h1 = jnp.maximum(h1, 0.0)

    h2 = jnp.dot(h1.astype(jnp.bfloat16), w2_ref[...],
                 preferred_element_type=jnp.float32) + b2_ref[...]
    h2 = jnp.maximum(h2, 0.0)                                          # [TB, fc2] f32

    # ---- heads: one packed MXU matmul -> (TB, 2); col 0 = mu head, col 1 = sigma head ----
    pre = jnp.dot(h2.astype(jnp.bfloat16), wh_ref[...],
                  preferred_element_type=jnp.float32) + bh_ref[...]    # [TB, 2] f32

    mu = jnp.tanh(pre) * jnp.float32(action_bound)
    sigma = _softplus(pre)
    col = lax.broadcasted_iota(jnp.int32, pre.shape, 1)
    out_ref[...] = jnp.where(col == 0, mu, sigma).astype(out_ref.dtype)


def _default_tb_max():
    """Generation-aware batch-tile cap (safe fallback if device query fails)."""
    try:
        kind = jax.devices()[0].device_kind.lower()
        if "v7" in kind:
            return 256   # 2 TCs/chip: keep the grid >= 2 tiles for mid-size batches
    except Exception:
        pass
    return 1024          # single-TC v5e/v6e: bigger tiles amortize per-step overhead


def actor_net_forward(x, params, action_bound, tb_max=None):
    """x: [B, n_states] float32 -> (mu [B,1], sigma [B,1]) float32."""
    w1, b1, w2, b2, wh, bh = params
    B, n_states = x.shape
    fc1 = w1.shape[1]
    fc2 = w2.shape[1]

    if tb_max is None:
        tb_max = _default_tb_max()

    # Balanced batch tiling: n_tiles = cdiv(B, tb_max), TB = cdiv(B, n_tiles) rounded to
    # the sublane multiple (8).  Pad waste is bounded to < 8 rows per tile.
    n_tiles = max(1, pl.cdiv(B, tb_max))
    TB = _round_up(pl.cdiv(B, n_tiles), 8)
    Bp = TB * n_tiles

    if Bp != B:
        x = jnp.pad(x, ((0, Bp - B), (0, 0)))

    const = lambda a: pl.BlockSpec(a.shape, lambda i: (0,) * a.ndim)

    flops = 2 * Bp * (n_states * fc1 + fc1 * fc2 + fc2 * 2)
    transcendentals = 6 * Bp  # tanh + exp + log1p on both output columns per row
    bytes_accessed = (
        Bp * n_states * 4                                          # x streamed as f32
        + sum(int(p.size) * p.dtype.itemsize for p in params)      # resident weights
        + Bp * 2 * 4                                               # packed (mu, sigma) out
    )

    out = pl.pallas_call(
        functools.partial(actor_kernel, action_bound=float(action_bound)),
        out_shape=jax.ShapeDtypeStruct((Bp, 2), jnp.float32),
        grid=(n_tiles,),
        in_specs=[
            pl.BlockSpec((TB, n_states), lambda i: (i, 0)),  # x: streamed per batch tile
            const(w1), const(b1), const(w2), const(b2),      # trunk weights: resident
            const(wh), const(bh),                            # packed heads: resident
        ],
        out_specs=pl.BlockSpec((TB, 2), lambda i: (i, 0)),
        compiler_params=pltpu.CompilerParams(
            dimension_semantics=("parallel",)),
        cost_estimate=pl.CostEstimate(
            flops=flops,
            transcendentals=transcendentals,
            bytes_accessed=bytes_accessed),
    )(x, w1, b1, w2, b2, wh, bh)

    # Padded rows (Bp > B) are garbage -> correctness relies on slicing here.
    mu = out[:B, 0:1]
    sigma = out[:B, 1:2]
    return mu, sigma


def init_params(key, n_states, fc1_dims=128, fc2_dims=128):
    """PyTorch-style uniform(-1/sqrt(fan_in), 1/sqrt(fan_in)) init.

    Trunk weights stored as [in, out] bf16 (x @ W on the MXU); the two 1-wide heads are
    packed into wh = [fc2, 2] bf16 (col 0: mu, col 1: sigma) and bh = [1, 2] f32.
    """
    ks = jax.random.split(key, 8)

    def linear(kw, kb, fan_in, fan_out):
        bound = 1.0 / (fan_in ** 0.5)
        w = jax.random.uniform(kw, (fan_in, fan_out), jnp.float32, -bound, bound)
        b = jax.random.uniform(kb, (1, fan_out), jnp.float32, -bound, bound)
        return w, b

    w1, b1 = linear(ks[0], ks[1], n_states, fc1_dims)
    w2, b2 = linear(ks[2], ks[3], fc1_dims, fc2_dims)
    wmu, bmu = linear(ks[4], ks[5], fc2_dims, 1)
    wsig, bsig = linear(ks[6], ks[7], fc2_dims, 1)

    wh = jnp.concatenate([wmu, wsig], axis=1).astype(jnp.bfloat16)   # (fc2, 2)
    bh = jnp.concatenate([bmu, bsig], axis=1)                        # (1, 2) f32
    return (w1.astype(jnp.bfloat16), b1, w2.astype(jnp.bfloat16), b2, wh, bh)


def actor_net_reference(x, params, action_bound):
    """Pure-JAX reference mirroring the kernel's numerics (bf16 matmuls, f32 accum).

    NOTE: the bf16 trunk/head matmuls are an intentional precision choice; outputs differ
    from an all-f32 PyTorch ActorNet at ~1e-3 level.
    """
    w1, b1, w2, b2, wh, bh = params
    xb = x.astype(jnp.bfloat16)
    h1 = jnp.maximum(jnp.dot(xb, w1, preferred_element_type=jnp.float32) + b1, 0.0)
    h2 = jnp.maximum(jnp.dot(h1.astype(jnp.bfloat16), w2,
                             preferred_element_type=jnp.float32) + b2, 0.0)
    pre = jnp.dot(h2.astype(jnp.bfloat16), wh, preferred_element_type=jnp.float32) + bh
    mu = jnp.tanh(pre[:, 0:1]) * jnp.float32(action_bound)
    sigma = _softplus(pre[:, 1:2])
    return mu, sigma


if __name__ == "__main__":
    key = jax.random.PRNGKey(0)
    k_x, k_p = jax.random.split(key)

    B = 8           # batch of states
    n_states = 32   # state vector dimension (e.g. UR16e obs dim)
    action_bound = 2.0

    x = jax.random.normal(k_x, (B, n_states), dtype=jnp.float32)
    params = init_params(k_p, n_states)

    mu, sigma = actor_net_forward(x, params, action_bound)
    mu, sigma = jax.block_until_ready((mu, sigma))

    mu_ref, sigma_ref = actor_net_reference(x, params, action_bound)
    assert mu.shape == (B, 1), mu.shape
    assert sigma.shape == (B, 1), sigma.shape
    assert jnp.allclose(mu, mu_ref, atol=1e-3, rtol=1e-3), "mu mismatch vs reference"
    assert jnp.allclose(sigma, sigma_ref, atol=1e-3, rtol=1e-3), "sigma mismatch vs reference"
    assert bool(jnp.all(sigma > 0.0)), "softplus output must be positive"

    print("KERNEL_OK")
</pallas_src>

<mosaic_0001>
module attributes {stable_mosaic.version = 11 : i64} {
  func.func @actor_kernel(%arg0: i32, %arg1: memref<8x32xf32, #tpu.memory_space<vmem>>, %arg2: memref<32x128xbf16, #tpu.memory_space<vmem>>, %arg3: memref<1x128xf32, #tpu.memory_space<vmem>>, %arg4: memref<128x128xbf16, #tpu.memory_space<vmem>>, %arg5: memref<1x128xf32, #tpu.memory_space<vmem>>, %arg6: memref<128x2xbf16, #tpu.memory_space<vmem>>, %arg7: memref<1x2xf32, #tpu.memory_space<vmem>>, %arg8: memref<8x2xf32, #tpu.memory_space<vmem>>) attributes {dimension_semantics = [#tpu.dimension_semantics<parallel>], iteration_bounds = array<i64: 1>, scalar_prefetch = 0 : i64, scratch_operands = 0 : i64, tpu.core_type = #tpu.core_type<tc>, window_params = [{transform_indices = @transform_0, window_bounds = array<i64: 8, 32>}, {pipeline_mode = #tpu.pipeline_mode<synchronous>, transform_indices = @transform_1, window_bounds = array<i64: 32, 128>}, {pipeline_mode = #tpu.pipeline_mode<synchronous>, transform_indices = @transform_2, window_bounds = array<i64: 1, 128>}, {pipeline_mode = #tpu.pipeline_mode<synchronous>, transform_indices = @transform_3, window_bounds = array<i64: 128, 128>}, {pipeline_mode = #tpu.pipeline_mode<synchronous>, transform_indices = @transform_4, window_bounds = array<i64: 1, 128>}, {pipeline_mode = #tpu.pipeline_mode<synchronous>, transform_indices = @transform_5, window_bounds = array<i64: 128, 2>}, {pipeline_mode = #tpu.pipeline_mode<synchronous>, transform_indices = @transform_6, window_bounds = array<i64: 1, 2>}, {transform_indices = @transform_7, window_bounds = array<i64: 8, 2>}]} {
    %c0 = arith.constant 0 : index
    %c0_0 = arith.constant 0 : index
    %0 = vector.load %arg1[%c0, %c0_0] : memref<8x32xf32, #tpu.memory_space<vmem>>, vector<8x32xf32>
    %1 = arith.truncf %0 : vector<8x32xf32> to vector<8x32xbf16>
    %c0_1 = arith.constant 0 : index
    %c0_2 = arith.constant 0 : index
    %2 = vector.load %arg2[%c0_1, %c0_2] : memref<32x128xbf16, #tpu.memory_space<vmem>>, vector<32x128xbf16>
    %cst = arith.constant dense<0.000000e+00> : vector<8x128xf32>
    %3 = tpu.matmul %1, %2, %cst {dimension_numbers = #tpu.dot_dimension_numbers<[1], [0], [0], [1], [0, 0, 1, 1], [], []>} : vector<8x32xbf16>, vector<32x128xbf16>, vector<8x128xf32> -> vector<8x128xf32>
    %c0_3 = arith.constant 0 : index
    %c0_4 = arith.constant 0 : index
    %4 = vector.load %arg3[%c0_3, %c0_4] : memref<1x128xf32, #tpu.memory_space<vmem>>, vector<1x128xf32>
    %5 = vector.broadcast %4 : vector<1x128xf32> to vector<8x128xf32>
    %6 = arith.addf %3, %5 : vector<8x128xf32>
    %cst_5 = arith.constant 0.000000e+00 : f32
    %7 = vector.broadcast %cst_5 : f32 to vector<8x128xf32>
    %8 = arith.maximumf %6, %7 : vector<8x128xf32>
    %9 = arith.truncf %8 : vector<8x128xf32> to vector<8x128xbf16>
    %c0_6 = arith.constant 0 : index
    %c0_7 = arith.constant 0 : index
    %10 = vector.load %arg4[%c0_6, %c0_7] : memref<128x128xbf16, #tpu.memory_space<vmem>>, vector<128x128xbf16>
    %cst_8 = arith.constant dense<0.000000e+00> : vector<8x128xf32>
    %11 = tpu.matmul %9, %10, %cst_8 {dimension_numbers = #tpu.dot_dimension_numbers<[1], [0], [0], [1], [0, 0, 1, 1], [], []>} : vector<8x128xbf16>, vector<128x128xbf16>, vector<8x128xf32> -> vector<8x128xf32>
    %c0_9 = arith.constant 0 : index
    %c0_10 = arith.constant 0 : index
    %12 = vector.load %arg5[%c0_9, %c0_10] : memref<1x128xf32, #tpu.memory_space<vmem>>, vector<1x128xf32>
    %13 = vector.broadcast %12 : vector<1x128xf32> to vector<8x128xf32>
    %14 = arith.addf %11, %13 : vector<8x128xf32>
    %cst_11 = arith.constant 0.000000e+00 : f32
    %15 = vector.broadcast %cst_11 : f32 to vector<8x128xf32>
    %16 = arith.maximumf %14, %15 : vector<8x128xf32>
    %17 = arith.truncf %16 : vector<8x128xf32> to vector<8x128xbf16>
    %c0_12 = arith.constant 0 : index
    %c0_13 = arith.constant 0 : index
    %18 = vector.load %arg6[%c0_12, %c0_13] : memref<128x2xbf16, #tpu.memory_space<vmem>>, vector<128x2xbf16>
    %cst_14 = arith.constant dense<0.000000e+00> : vector<8x2xf32>
    %19 = tpu.matmul %17, %18, %cst_14 {dimension_numbers = #tpu.dot_dimension_numbers<[1], [0], [0], [1], [0, 0, 1, 1], [], []>} : vector<8x128xbf16>, vector<128x2xbf16>, vector<8x2xf32> -> vector<8x2xf32>
    %c0_15 = arith.constant 0 : index
    %c0_16 = arith.constant 0 : index
    %20 = vector.load %arg7[%c0_15, %c0_16] : memref<1x2xf32, #tpu.memory_space<vmem>>, vector<1x2xf32>
    %21 = vector.broadcast %20 : vector<1x2xf32> to vector<8x2xf32>
    %22 = arith.addf %19, %21 : vector<8x2xf32>
    %23 = math.tanh %22 : vector<8x2xf32>
    %cst_17 = arith.constant 2.000000e+00 : f32
    %24 = vector.broadcast %cst_17 : f32 to vector<8x2xf32>
    %25 = arith.mulf %23, %24 : vector<8x2xf32>
    %cst_18 = arith.constant 0.000000e+00 : f32
    %26 = vector.broadcast %cst_18 : f32 to vector<8x2xf32>
    %27 = arith.maximumf %22, %26 : vector<8x2xf32>
    %28 = math.absf %22 : vector<8x2xf32>
    %cst_19 = arith.constant 0.000000e+00 : f32
    %29 = vector.broadcast %cst_19 : f32 to vector<8x2xf32>
    %30 = arith.subf %29, %28 : vector<8x2xf32>
    %31 = math.exp %30 : vector<8x2xf32>
    %32 = math.log1p %31 : vector<8x2xf32>
    %33 = arith.addf %27, %32 : vector<8x2xf32>
    %34 = tpu.iota {dimensions = array<i32: 1>} : vector<8x2xi32>
    %c0_i32 = arith.constant 0 : i32
    %35 = vector.broadcast %c0_i32 : i32 to vector<8x2xi32>
    %36 = arith.cmpi eq, %34, %35 : vector<8x2xi32>
    %37 = arith.select %36, %25, %33 : vector<8x2xi1>, vector<8x2xf32>
    %c0_20 = arith.constant 0 : index
    %c0_21 = arith.constant 0 : index
    %38 = vector.load %arg8[%c0_20, %c0_21] : memref<8x2xf32, #tpu.memory_space<vmem>>, vector<8x2xf32>
    tpu.vector_store %arg8[%c0_20, %c0_21], %37 {strides = array<i32>} : memref<8x2xf32, #tpu.memory_space<vmem>>, vector<8x2xf32>,
    return
  }
  func.func @transform_0(%arg0: i32) -> (i32, i32) {
    %c0_i32 = arith.constant 0 : i32
    %c0_i32_0 = arith.constant 0 : i32
    return %arg0, %c0_i32 : i32, i32
  }
  func.func @transform_1(%arg0: i32) -> (i32, i32) {
    %c0_i32 = arith.constant 0 : i32
    %c0_i32_0 = arith.constant 0 : i32
    %c0_i32_1 = arith.constant 0 : i32
    return %c0_i32, %c0_i32_0 : i32, i32
  }
  func.func @transform_2(%arg0: i32) -> (i32, i32) {
    %c0_i32 = arith.constant 0 : i32
    %c0_i32_0 = arith.constant 0 : i32
    %c0_i32_1 = arith.constant 0 : i32
    return %c0_i32, %c0_i32_0 : i32, i32
  }
  func.func @transform_3(%arg0: i32) -> (i32, i32) {
    %c0_i32 = arith.constant 0 : i32
    %c0_i32_0 = arith.constant 0 : i32
    %c0_i32_1 = arith.constant 0 : i32
    return %c0_i32, %c0_i32_0 : i32, i32
  }
  func.func @transform_4(%arg0: i32) -> (i32, i32) {
    %c0_i32 = arith.constant 0 : i32
    %c0_i32_0 = arith.constant 0 : i32
    %c0_i32_1 = arith.constant 0 : i32
    return %c0_i32, %c0_i32_0 : i32, i32
  }
  func.func @transform_5(%arg0: i32) -> (i32, i32) {
    %c0_i32 = arith.constant 0 : i32
    %c0_i32_0 = arith.constant 0 : i32
    %c0_i32_1 = arith.constant 0 : i32
    return %c0_i32, %c0_i32_0 : i32, i32
  }
  func.func @transform_6(%arg0: i32) -> (i32, i32) {
    %c0_i32 = arith.constant 0 : i32
    %c0_i32_0 = arith.constant 0 : i32
    %c0_i32_1 = arith.constant 0 : i32
    return %c0_i32, %c0_i32_0 : i32, i32
  }
  func.func @transform_7(%arg0: i32) -> (i32, i32) {
    %c0_i32 = arith.constant 0 : i32
    %c0_i32_0 = arith.constant 0 : i32
    return %arg0, %c0_i32 : i32, i32
  }
}

</mosaic_0001>

<bundles_post_ra>
// kernel: tpu_custom_call.1
= control target key start
LH: loop header
LB: loop body
LE: loop exit
PB: predicated region body
PF: predicated region fallthrough
CT: control target
= control target key end

     0   :  { %12 = vsyncpa [#allocation3], 0  ;;  %s678_s0 = inlined_call_operand.hbm [shape: f32[8,32], index: 0, kind: input, shape index: {}]   ;;  %s679_s1 = inlined_call_operand.hbm [shape: bf16[32,128], index: 1, kind: input, shape index: {}]   ;;  %s680_s2 = inlined_call_operand.vmem [shape: f32[1,128], index: 2, kind: input, shape index: {}]   ;;  %s681_s3 = inlined_call_operand.vmem [shape: bf16[128,128], index: 3, kind: input, shape index: {}]   ;;  %s682_s4 = inlined_call_operand.vmem [shape: f32[1,128], index: 4, kind: input, shape index: {}]   ;;  %s683_s5 = inlined_call_operand.vmem [shape: bf16[128,2], index: 5, kind: input, shape index: {}]   ;;  %s684_s6 = inlined_call_operand.vmem [shape: f32[1,2], index: 6, kind: input, shape index: {}]   ;;  %s685_s7 = inlined_call_operand.vmem [shape: f32[8,2], index: 7, kind: output, shape index: {}]  }
   0x1   :  { %13 = vsyncpa [#allocation5], 0  ;;  %s542_s24 = smov [#allocation2]   ;;  %s543_s26 = smov [#allocation4]  }
   0x2   :  { %s20_s25 = sshll.u32 %s542_s24, 4  ;;  %s29_s27 = sshll.u32 %s543_s26, 4  ;;  %s21_s25 = int_to_ptr.vmem [resolvable:$true] %s20_s25  ;;  %s30_s27 = int_to_ptr.vmem [resolvable:$true] %s29_s27 }
   0x3   :  { %s506_s28 = scalar_lea.vmem %s21_s25, 128  ;;  %p511_p1 = scmp.lt.s32.totalorder %s21_s25, %s21_s25 }
   0x4   :  { %p507_p0 = scmp.ne.s32.totalorder %s21_s25, %s506_s28  ;;  %p512_p2 = scmp.lt.s32.totalorder %s506_s28, %s506_s28 }
   0x6   :  { %p513_p3 = por %p512_p2, %p511_p1 }
   0x8   :  { %p514_p4 = pnand %p513_p3, %p507_p0 }
   0xa   :  { %517 = shalt.err (!%p514_p4)
}
   0xb   :  { %23 = dma.hbm_to_vmem [thread:$0]  %s678_s0, 128, %s21_s25, [#allocation3]  }
   0xc   :  { %s526_s8 = scalar_lea.vmem %s30_s27, 256  ;;  %p531_p6 = scmp.lt.s32.totalorder %s30_s27, %s30_s27 }
   0xd   :  { %p527_p5 = scmp.ne.s32.totalorder %s30_s27, %s526_s8  ;;  %p532_p7 = scmp.lt.s32.totalorder %s526_s8, %s526_s8 }
   0xf   :  { %p533_p8 = por %p532_p7, %p531_p6 }
  0x11   :  { %p534_p9 = pnand %p533_p8, %p527_p5 }
  0x13   :  { %537 = shalt.err (!%p534_p9)
}
  0x14   :  { %s544_s9 = smov 64   ;;  %s545_s10 = smov 4  }
  0x15   :  { %35 = dma.hbm_to_vmem [thread:$0]  %s679_s1, 256, %s30_s27, [#allocation5], %s544_s9, %s544_s9, %s545_s10  }
  0x16   :  { %538 = dma.done.wait [#allocation3], 128  }
  0x17   :  { %539 = vsyncadd [#allocation3], 4294967168 }
  0x18   :  { %540 = dma.done.wait [#allocation5], 256  }
  0x19   :  { %541 = vsyncadd [#allocation5], 4294967040  ;;  %v546_v0 = vmov 0.0   ;;  %vm547_vm0 = vmmov 0   ;;  %v474_v1 = vld [vmem:[#allocation4 + $0x8] sm:$0xff]   ;;  %v475_v2 = vld [vmem:[#allocation4] sm:$0xff]   ;;  %v365_v49 = vlaneseq }
  0x1a   :  { %420 = vmatprep.subr.bf16.mxu0 %v546_v0  ;;  %424 = vmatprep.mubr.msk.bf16.mxu0 %vm547_vm0, %v546_v0  ;;  %v53_v3 = vld [vmem:[#allocation2] sm:$0xff]  ;;  %v476_v4 = vld [vmem:[%s681_s3 + $0x38] sm:$0xff]   ;;  %v477_v6 = vld [vmem:[%s681_s3 + $0x30] sm:$0xff]   ;;  %vm78_vm1 = vcmask 261120   ;;  %vm369_vm4 = vcmask 15360  }
  0x1b   :  { %428 = vmatprep.subr.bf16.mxu1 %v546_v0  ;;  %444 = vmatprep.mubr.msk.bf16.mxu1 %vm547_vm0, %v546_v0  ;;  %v54_v5 = vpack.c.bf16 %v53_v3, %v53_v3  ;;  %v478_v7 = vld [vmem:[%s681_s3 + $0x28] sm:$0xff]   ;;  %v479_v8 = vld [vmem:[%s681_s3 + $0x20] sm:$0xff]   ;;  %v480_v9 = vld [vmem:[%s681_s3 + $0x18] sm:$0xff]   ;;  %v366_v52 = vand.u32 127, %v365_v49 }
  0x1c   :  { %421 = vmatpush3.bf16.msra.mxu0 %v474_v1  ;;  %429 = vmatpush3.bf16.msra.mxu1 %v476_v4  ;;  %v481_v10 = vld [vmem:[%s681_s3 + $0x10] sm:$0xff]   ;;  %v482_v11 = vld [vmem:[%s681_s3 + $0x8] sm:$0xff]   ;;  %v483_v12 = vld [vmem:[%s681_s3] sm:$0xff]  }
  0x1d   :  { %422 = vmatprep.subr.bf16.mxu0 %v546_v0  ;;  %430 = vmatprep.subr.bf16.mxu1 %v546_v0  ;;  %v484_v13 = vld [vmem:[%s683_s5 + $0x38] sm:$0xff]   ;;  %v485_v14 = vld [vmem:[%s683_s5 + $0x30] sm:$0xff]   ;;  %v486_v15 = vld [vmem:[%s683_s5 + $0x28] sm:$0xff]   ;;  %vm367_vm3 = vcmp.eq.s32.totalorder %v366_v52, 0 }
  0x1e   :  { %v487_v16 = vld [vmem:[%s683_s5 + $0x20] sm:$0xff]   ;;  %v488_v17 = vld [vmem:[%s683_s5 + $0x18] sm:$0xff]   ;;  %v489_v18 = vld [vmem:[%s683_s5 + $0x10] sm:$0xff]  }
  0x1f   :  { %v377_v19 = vld [vmem:[%s680_s2] ss:$0 sm:$0xff]  ;;  %v490_v27 = vld [vmem:[%s683_s5 + $0x8] sm:$0xff]  }
  0x20   :  { %423 = vmatpush3.bf16.msra.mxu0 %v475_v2  ;;  %431 = vmatpush3.bf16.msra.mxu1 %v477_v6  ;;  %v491_v28 = vld [vmem:[%s683_s5] sm:$0xff]  }
  0x21   :  { %448 = vmatprep.subr.bf16.mxu0 %v546_v0  ;;  %432 = vmatprep.subr.bf16.mxu1 %v546_v0  ;;  %v381_v29 = vld [vmem:[%s682_s4] ss:$0 sm:$0xff] }
  0x22   :  { %v390_v37 = vld [vmem:[%s684_s6] ss:$0 sm:$0xff] }
  0x23   :  { %425 = vmatmul.mubr.msk.bf16.vlgmr.msra.gmra.mxu0 %vm78_vm1, %v54_v5 }
  0x24   :  { %464 = vmatprep.mubr.msk.bf16.mxu0 %vm547_vm0, %v546_v0  ;;  %433 = vmatpush3.bf16.msra.mxu1 %v478_v7 }
  0x25   :  { %434 = vmatprep.subr.bf16.mxu1 %v546_v0  ;;  %449 = vmatpush3.bf16.msra.mxu0 %v484_v13 }
  0x26   :  { %450 = vmatprep.subr.bf16.mxu0 %v546_v0 }
  0x28   :  { %435 = vmatpush3.bf16.msra.mxu1 %v479_v8 }
  0x29   :  { %436 = vmatprep.subr.bf16.mxu1 %v546_v0  ;;  %451 = vmatpush3.bf16.msra.mxu0 %v485_v14 }
  0x2a   :  { %452 = vmatprep.subr.bf16.mxu0 %v546_v0 }
  0x2c   :  { %437 = vmatpush3.bf16.msra.mxu1 %v480_v9 }
  0x2d   :  { %438 = vmatprep.subr.bf16.mxu1 %v546_v0  ;;  %453 = vmatpush3.bf16.msra.mxu0 %v486_v15 }
  0x2e   :  { %454 = vmatprep.subr.bf16.mxu0 %v546_v0 }
  0x30   :  { %439 = vmatpush3.bf16.msra.mxu1 %v481_v10 }
  0x31   :  { %440 = vmatprep.subr.bf16.mxu1 %v546_v0  ;;  %455 = vmatpush3.bf16.msra.mxu0 %v487_v16 }
  0x32   :  { %456 = vmatprep.subr.bf16.mxu0 %v546_v0 }
  0x34   :  { %441 = vmatpush3.bf16.msra.mxu1 %v482_v11 }
  0x35   :  { %442 = vmatprep.subr.bf16.mxu1 %v546_v0  ;;  %457 = vmatpush3.bf16.msra.mxu0 %v488_v17 }
  0x36   :  { %458 = vmatprep.subr.bf16.mxu0 %v546_v0 }
  0x38   :  { %443 = vmatpush3.bf16.msra.mxu1 %v483_v12 }
  0x39   :  { %459 = vmatpush3.bf16.msra.mxu0 %v489_v18 }
  0x3a   :  { %460 = vmatprep.subr.bf16.mxu0 %v546_v0 }
  0x3d   :  { %461 = vmatpush3.bf16.msra.mxu0 %v490_v27 }
  0x3e   :  { %462 = vmatprep.subr.bf16.mxu0 %v546_v0 }
  0x41   :  { %463 = vmatpush3.bf16.msra.mxu0 %v491_v28 }
  0xe3   :  { %v116_v20 = vpop.f32.mrf.mxu0 }
  0xe4   :  { %v117_v21 = vadd.f32 %v377_v19, %v116_v20 }
  0xe5   :  { %v426_v22 = vpop.f32.mrf.mxu0 }
  0xe6   :  { %v122_v23 = vmax.f32 %v117_v21, 0.0 }
  0xe7   :  { %v119_v24 = vpop.f32.mrf.mxu0 }
  0xe8   :  { %v123_v25 = vpack.c.bf16 %v122_v23, %v122_v23 }
  0xe9   :  { %v427_v26 = vpop.f32.mrf.mxu0 }
  0xea   :  { %445 = vmatmul.mubr.bf16.vlgmr.msra.gmra.mxu1 %v123_v25 }
 0x1aa   :  { %v229_v30 = vpop.f32.mrf.mxu1 }
 0x1ab   :  { %v230_v31 = vadd.f32 %v381_v29, %v229_v30 }
 0x1ac   :  { %v446_v32 = vpop.f32.mrf.mxu1 }
 0x1ad   :  { %v235_v33 = vmax.f32 %v230_v31, 0.0 }
 0x1ae   :  { %v232_v34 = vpop.f32.mrf.mxu1 }
 0x1af   :  { %v236_v35 = vpack.c.bf16 %v235_v33, %v235_v33 }
 0x1b0   :  { %v447_v36 = vpop.f32.mrf.mxu1 }
 0x1b1   :  { %465 = vmatmul.mubr.bf16.vlgmr.msra.gmra.mxu0 %v236_v35 }
 0x271   :  { %v342_v38 = vpop.f32.mrf.mxu0 }
 0x272   :  { %v343_v39 = vadd.f32 %v390_v37, %v342_v38 }
 0x273   :  { %v466_v40 = vpop.f32.mrf.mxu0 }
 0x274   :  { %v351_v41 = vand.u32 2147483647, %v343_v39  ;;  %v350_v57 = vmax.f32 %v343_v39, 0.0 }
 0x275   :  { %v345_v42 = vpop.f32.mrf.mxu0 }
 0x276   :  { %v352_v43 = vsub.f32 0.0, %v351_v41 }
 0x277   :  { %v467_v44 = vpop.f32.mrf.mxu0 }
 0x278   :  { %v353_v45 = vmul.f32 1.442695, %v352_v43 }
 0x27a   :  { %492 = vpow2.f32 %v353_v45 }
 0x287   :  { %v493_v46 = vpop.eup %492 }
 0x288   :  { %v355_v47 = vadd.f32 1.0, %v493_v46  ;;  %v358_v48 = vmul.f32 -0.5, %v493_v46  ;;  %v361_v51 = vand.u32 2147483647, %v493_v46 }
 0x28a   :  { %494 = vlog2.f32 %v355_v47  ;;  %v359_v50 = vadd.f32 1.0, %v358_v48  ;;  %vm362_vm2 = vcmp.lt.f32.partialorder %v361_v51, 0.0004427343 }
 0x28b   :  { %496 = vtanh.f32 %v343_v39 }
 0x28c   :  { %v360_v56 = vmul.f32 %v493_v46, %v359_v50 }
 0x297   :  { %v495_v53 = vpop.eup %494 }
 0x298   :  { %v497_v54 = vpop.eup %496  ;;  %v357_v55 = vmul.f32 0.6931472, %v495_v53 }
 0x299   :  { %v349_v59 = vmul.f32 2.0, %v497_v54 }
 0x29a   :  { %v363_v58 = vsel %vm362_vm2, %v360_v56, %v357_v55 }
 0x29b   :  { %v364_v60 = vadd.f32 %v363_v58, %v350_v57 }
 0x29d   :  { %v368_v61 = vsel %vm367_vm3, %v349_v59, %v364_v60 }
 0x29e   :  { %370 = vst.msk [vmem:[%s685_s7] sm:$0xff] %vm369_vm4, %v368_v61 }
 0x29f   :  { %375 = vsyncpa [#allocation3], 1 }
 0x2a0   :  { %376 = vsyncpa [#allocation5], 1 }

</bundles_post_ra>
